<compile_context>
chip_gen: v7x
topology: tpu7x:2x2x1
jax: 0.10.0
libtpu: 0.0.40
codegen_flags: <defaults>
</compile_context>

<pallas_src>
import functools

import jax
import jax.numpy as jnp
from jax.experimental import pallas as pl
from jax.experimental.pallas import tpu as pltpu


def _round_up(x, m):
    return ((x + m - 1) // m) * m


def _mean_std_kernel(s_ref, a_ref, w1_ref, b1_ref, w2_ref, b2_ref,
                     wh_ref, bh_ref, mean_ref, std_ref):
    f32 = jnp.float32

    # in-kernel lane concat of the streamed tiles; single layer-1 MXU push
    x = jnp.concatenate([s_ref[...], a_ref[...]], axis=-1)       # (TB, S+A)
    h = jnp.dot(x, w1_ref[...], preferred_element_type=f32) + b1_ref[...]
    h = jnp.maximum(h, 0.0)

    # shared layer 2 + ReLU
    h = jnp.dot(h.astype(w2_ref.dtype), w2_ref[...],
                preferred_element_type=f32) + b2_ref[...]
    h = jnp.maximum(h, 0.0)

    # fused heads: one (H, 2S) MXU push for [mean | log_std]
    head = jnp.dot(h.astype(wh_ref.dtype), wh_ref[...],
                   preferred_element_type=f32) + bh_ref[...]

    s_dim = mean_ref.shape[-1]
    mean_ref[...] = head[:, :s_dim].astype(mean_ref.dtype)
    log_std = jnp.clip(head[:, s_dim:], -20.0, 2.0)               # std half only
    std_ref[...] = jnp.exp(log_std).astype(std_ref.dtype)


def _mean_std_pallas(state, action, params, compute_dtype, block_b):
    B, S = state.shape
    A = action.shape[1]
    H = params["w1"].shape[1]
    cd = compute_dtype
    f32 = jnp.float32

    # resident weights (streamed dtype); biases stay f32 for exact adds
    w1 = params["w1"].astype(cd)                                   # (S+A, H)
    w2 = params["w2"].astype(cd)                                   # (H, H)
    wh = jnp.concatenate([params["wm"], params["ws"]], axis=1).astype(cd)
    b1 = params["b1"].astype(f32)
    b2 = params["b2"].astype(f32)
    bh = jnp.concatenate([params["bm"], params["bs"]], axis=1).astype(f32)

    s = state.astype(cd)
    a = action.astype(cd)

    # Batch tile: multiple of 8, at least 2 grid steps when B > 8 (v7x TC
    # sharding), capped by block_b. Ragged last block is handled by Pallas.
    if B <= 8:
        TB = B
    else:
        TB = min(block_b, _round_up(pl.cdiv(B, 2), 8))
    n_tiles = pl.cdiv(B, TB)

    cost = pl.CostEstimate(
        flops=2 * B * ((S + A) * H + H * H + H * 2 * S),
        transcendentals=B * S,
        bytes_accessed=(B * (S + A) * 2                       # bf16 inputs
                        + 2 * B * S * 4                       # f32 outputs
                        + ((S + A) * H + H * H + H * 2 * S) * 2   # bf16 weights
                        + (2 * H + 2 * S) * 4),               # f32 biases
    )

    mean, std = pl.pallas_call(
        _mean_std_kernel,
        out_shape=(jax.ShapeDtypeStruct((B, S), f32),
                   jax.ShapeDtypeStruct((B, S), f32)),
        grid=(n_tiles,),
        in_specs=[
            pl.BlockSpec((TB, S), lambda i: (i, 0)),       # state   (streamed)
            pl.BlockSpec((TB, A), lambda i: (i, 0)),       # action  (streamed)
            pl.BlockSpec((S + A, H), lambda i: (0, 0)),    # w1      (resident)
            pl.BlockSpec((1, H), lambda i: (0, 0)),        # b1
            pl.BlockSpec((H, H), lambda i: (0, 0)),        # w2
            pl.BlockSpec((1, H), lambda i: (0, 0)),        # b2
            pl.BlockSpec((H, 2 * S), lambda i: (0, 0)),    # [wm | ws]
            pl.BlockSpec((1, 2 * S), lambda i: (0, 0)),    # [bm | bs]
        ],
        out_specs=(pl.BlockSpec((TB, S), lambda i: (i, 0)),
                   pl.BlockSpec((TB, S), lambda i: (i, 0))),
        compiler_params=pltpu.CompilerParams(
            dimension_semantics=("parallel",)),
        cost_estimate=cost,
    )(s, a, w1, b1, w2, b2, wh, bh)
    return mean, std


def _mean_std_xla(state, action, p, compute_dtype):
    """Fused plain-XLA path for tiny batches (launch cost > compute)."""
    cd = compute_dtype
    f32 = jnp.float32
    x = jnp.concatenate([state, action], axis=-1).astype(cd)
    h = jnp.dot(x, p["w1"].astype(cd), preferred_element_type=f32) + p["b1"]
    h = jnp.maximum(h, 0.0)
    h = jnp.dot(h.astype(cd), p["w2"].astype(cd),
                preferred_element_type=f32) + p["b2"]
    h = jnp.maximum(h, 0.0)
    mean = jnp.dot(h.astype(cd), p["wm"].astype(cd),
                   preferred_element_type=f32) + p["bm"]
    log_std = jnp.dot(h.astype(cd), p["ws"].astype(cd),
                      preferred_element_type=f32) + p["bs"]
    log_std = jnp.clip(log_std, -20.0, 2.0)
    return mean, jnp.exp(log_std)


@functools.partial(jax.jit,
                   static_argnames=("compute_dtype", "block_b",
                                    "min_pallas_batch"))
def mean_std_predictor(state, action, params, *, compute_dtype=jnp.bfloat16,
                       block_b=4096, min_pallas_batch=64):
    """state: (B, S), action: (B, A) -> (mean, std), each (B, S) float32."""
    assert block_b >= 8 and block_b % 8 == 0
    B = state.shape[0]
    if B < min_pallas_batch:
        return _mean_std_xla(state, action, params, compute_dtype)
    return _mean_std_pallas(state, action, params, compute_dtype, block_b)


def init_params(key, state_dim, action_dim, hidden_dim=128):
    """torch.nn.Linear-style init (U(-1/sqrt(fan_in), 1/sqrt(fan_in))),
    log_std_head bias forced to -1.0 as in the module."""
    def linear(key, fan_in, fan_out):
        kw, kb = jax.random.split(key)
        bound = 1.0 / jnp.sqrt(fan_in)
        w = jax.random.uniform(kw, (fan_in, fan_out), jnp.float32, -bound, bound)
        b = jax.random.uniform(kb, (1, fan_out), jnp.float32, -bound, bound)
        return w, b

    k1, k2, k3, k4 = jax.random.split(key, 4)
    in_dim = state_dim + action_dim
    w1, b1 = linear(k1, in_dim, hidden_dim)
    w2, b2 = linear(k2, hidden_dim, hidden_dim)
    wm, bm = linear(k3, hidden_dim, state_dim)
    ws, _ = linear(k4, hidden_dim, state_dim)
    bs = jnp.full((1, state_dim), -1.0, jnp.float32)
    return dict(w1=w1, b1=b1, w2=w2, b2=b2, wm=wm, bm=bm, ws=ws, bs=bs)


def reference_forward(state, action, p, compute_dtype=jnp.bfloat16):
    """Pure-JAX reference mirroring the kernel's mixed-precision path."""
    return _mean_std_xla(state, action, p, compute_dtype)


if __name__ == "__main__":
    key = jax.random.PRNGKey(0)
    keys = jax.random.split(key, 7)

    STATE_DIM, ACTION_DIM, HIDDEN = 6, 3, 32
    params = init_params(keys[0], STATE_DIM, ACTION_DIM, HIDDEN)

    # --- Pallas path, 2 tiles (TB = 64) ---
    B = 128
    state = jax.random.normal(keys[1], (B, STATE_DIM), jnp.float32)
    action = jax.random.normal(keys[2], (B, ACTION_DIM), jnp.float32)
    mean, std = mean_std_predictor(state, action, params)
    jax.block_until_ready((mean, std))

    ref_mean, ref_std = reference_forward(state, action, params)
    assert mean.shape == (B, STATE_DIM) and std.shape == (B, STATE_DIM)
    assert jnp.allclose(mean, ref_mean, atol=2e-3, rtol=2e-3)
    assert jnp.allclose(std, ref_std, atol=2e-3, rtol=2e-3)
    assert bool(jnp.all(std > 0))

    # --- Pallas path, multi-tile with ragged last block (300 = 2*128 + 44) ---
    B2 = 300
    state2 = jax.random.normal(keys[3], (B2, STATE_DIM), jnp.float32)
    action2 = jax.random.normal(keys[4], (B2, ACTION_DIM), jnp.float32)
    mean2, std2 = mean_std_predictor(state2, action2, params, block_b=128)
    jax.block_until_ready((mean2, std2))

    ref_mean2, ref_std2 = reference_forward(state2, action2, params)
    assert mean2.shape == (B2, STATE_DIM) and std2.shape == (B2, STATE_DIM)
    assert jnp.allclose(mean2, ref_mean2, atol=2e-3, rtol=2e-3)
    assert jnp.allclose(std2, ref_std2, atol=2e-3, rtol=2e-3)
    assert bool(jnp.all(std2 > 0))

    # --- tiny-batch XLA fast path ---
    B3 = 4
    state3 = jax.random.normal(keys[5], (B3, STATE_DIM), jnp.float32)
    action3 = jax.random.normal(keys[6], (B3, ACTION_DIM), jnp.float32)
    mean3, std3 = mean_std_predictor(state3, action3, params)
    jax.block_until_ready((mean3, std3))
    ref_mean3, ref_std3 = reference_forward(state3, action3, params)
    assert jnp.allclose(mean3, ref_mean3, atol=2e-3, rtol=2e-3)
    assert jnp.allclose(std3, ref_std3, atol=2e-3, rtol=2e-3)
    assert bool(jnp.all(std3 > 0))

    print("KERNEL_OK")
</pallas_src>

<mosaic_0001>
module attributes {stable_mosaic.version = 11 : i64} {
  func.func @_mean_std_kernel(%arg0: i32, %arg1: memref<64x6xbf16, #tpu.memory_space<vmem>>, %arg2: memref<64x3xbf16, #tpu.memory_space<vmem>>, %arg3: memref<9x32xbf16, #tpu.memory_space<vmem>>, %arg4: memref<1x32xf32, #tpu.memory_space<vmem>>, %arg5: memref<32x32xbf16, #tpu.memory_space<vmem>>, %arg6: memref<1x32xf32, #tpu.memory_space<vmem>>, %arg7: memref<32x12xbf16, #tpu.memory_space<vmem>>, %arg8: memref<1x12xf32, #tpu.memory_space<vmem>>, %arg9: memref<64x6xf32, #tpu.memory_space<vmem>>, %arg10: memref<64x6xf32, #tpu.memory_space<vmem>>) attributes {dimension_semantics = [#tpu.dimension_semantics<parallel>], iteration_bounds = array<i64: 2>, scalar_prefetch = 0 : i64, scratch_operands = 0 : i64, tpu.core_type = #tpu.core_type<tc>, window_params = [{transform_indices = @transform_0, window_bounds = array<i64: 64, 6>}, {transform_indices = @transform_1, window_bounds = array<i64: 64, 3>}, {pipeline_mode = #tpu.pipeline_mode<synchronous>, transform_indices = @transform_2, window_bounds = array<i64: 9, 32>}, {pipeline_mode = #tpu.pipeline_mode<synchronous>, transform_indices = @transform_3, window_bounds = array<i64: 1, 32>}, {pipeline_mode = #tpu.pipeline_mode<synchronous>, transform_indices = @transform_4, window_bounds = array<i64: 32, 32>}, {pipeline_mode = #tpu.pipeline_mode<synchronous>, transform_indices = @transform_5, window_bounds = array<i64: 1, 32>}, {pipeline_mode = #tpu.pipeline_mode<synchronous>, transform_indices = @transform_6, window_bounds = array<i64: 32, 12>}, {pipeline_mode = #tpu.pipeline_mode<synchronous>, transform_indices = @transform_7, window_bounds = array<i64: 1, 12>}, {transform_indices = @transform_8, window_bounds = array<i64: 64, 6>}, {transform_indices = @transform_9, window_bounds = array<i64: 64, 6>}]} {
    %c0 = arith.constant 0 : index
    %c0_0 = arith.constant 0 : index
    %0 = vector.load %arg1[%c0, %c0_0] : memref<64x6xbf16, #tpu.memory_space<vmem>>, vector<64x6xbf16>
    %c0_1 = arith.constant 0 : index
    %c0_2 = arith.constant 0 : index
    %1 = vector.load %arg2[%c0_1, %c0_2] : memref<64x3xbf16, #tpu.memory_space<vmem>>, vector<64x3xbf16>
    %2 = tpu.concatenate %0, %1 in 1 : vector<64x6xbf16>, vector<64x3xbf16> -> vector<64x9xbf16>
    %c0_3 = arith.constant 0 : index
    %c0_4 = arith.constant 0 : index
    %3 = vector.load %arg3[%c0_3, %c0_4] : memref<9x32xbf16, #tpu.memory_space<vmem>>, vector<9x32xbf16>
    %cst = arith.constant dense<0.000000e+00> : vector<64x32xf32>
    %4 = tpu.matmul %2, %3, %cst {dimension_numbers = #tpu.dot_dimension_numbers<[1], [0], [0], [1], [0, 0, 1, 1], [], []>} : vector<64x9xbf16>, vector<9x32xbf16>, vector<64x32xf32> -> vector<64x32xf32>
    %c0_5 = arith.constant 0 : index
    %c0_6 = arith.constant 0 : index
    %5 = vector.load %arg4[%c0_5, %c0_6] : memref<1x32xf32, #tpu.memory_space<vmem>>, vector<1x32xf32>
    %6 = vector.broadcast %5 : vector<1x32xf32> to vector<64x32xf32>
    %7 = arith.addf %4, %6 : vector<64x32xf32>
    %cst_7 = arith.constant 0.000000e+00 : f32
    %8 = vector.broadcast %cst_7 : f32 to vector<64x32xf32>
    %9 = arith.maximumf %7, %8 : vector<64x32xf32>
    %10 = arith.truncf %9 : vector<64x32xf32> to vector<64x32xbf16>
    %c0_8 = arith.constant 0 : index
    %c0_9 = arith.constant 0 : index
    %11 = vector.load %arg5[%c0_8, %c0_9] : memref<32x32xbf16, #tpu.memory_space<vmem>>, vector<32x32xbf16>
    %cst_10 = arith.constant dense<0.000000e+00> : vector<64x32xf32>
    %12 = tpu.matmul %10, %11, %cst_10 {dimension_numbers = #tpu.dot_dimension_numbers<[1], [0], [0], [1], [0, 0, 1, 1], [], []>} : vector<64x32xbf16>, vector<32x32xbf16>, vector<64x32xf32> -> vector<64x32xf32>
    %c0_11 = arith.constant 0 : index
    %c0_12 = arith.constant 0 : index
    %13 = vector.load %arg6[%c0_11, %c0_12] : memref<1x32xf32, #tpu.memory_space<vmem>>, vector<1x32xf32>
    %14 = vector.broadcast %13 : vector<1x32xf32> to vector<64x32xf32>
    %15 = arith.addf %12, %14 : vector<64x32xf32>
    %cst_13 = arith.constant 0.000000e+00 : f32
    %16 = vector.broadcast %cst_13 : f32 to vector<64x32xf32>
    %17 = arith.maximumf %15, %16 : vector<64x32xf32>
    %18 = arith.truncf %17 : vector<64x32xf32> to vector<64x32xbf16>
    %c0_14 = arith.constant 0 : index
    %c0_15 = arith.constant 0 : index
    %19 = vector.load %arg7[%c0_14, %c0_15] : memref<32x12xbf16, #tpu.memory_space<vmem>>, vector<32x12xbf16>
    %cst_16 = arith.constant dense<0.000000e+00> : vector<64x12xf32>
    %20 = tpu.matmul %18, %19, %cst_16 {dimension_numbers = #tpu.dot_dimension_numbers<[1], [0], [0], [1], [0, 0, 1, 1], [], []>} : vector<64x32xbf16>, vector<32x12xbf16>, vector<64x12xf32> -> vector<64x12xf32>
    %c0_17 = arith.constant 0 : index
    %c0_18 = arith.constant 0 : index
    %21 = vector.load %arg8[%c0_17, %c0_18] : memref<1x12xf32, #tpu.memory_space<vmem>>, vector<1x12xf32>
    %22 = vector.broadcast %21 : vector<1x12xf32> to vector<64x12xf32>
    %23 = arith.addf %20, %22 : vector<64x12xf32>
    %24 = vector.extract_strided_slice %23 {offsets = [0, 0], sizes = [64, 6], strides = [1, 1]} : vector<64x12xf32> to vector<64x6xf32>
    %c0_19 = arith.constant 0 : index
    %c0_20 = arith.constant 0 : index
    %25 = vector.load %arg9[%c0_19, %c0_20] : memref<64x6xf32, #tpu.memory_space<vmem>>, vector<64x6xf32>
    tpu.vector_store %arg9[%c0_19, %c0_20], %24 {strides = array<i32>} : memref<64x6xf32, #tpu.memory_space<vmem>>, vector<64x6xf32>,
    %26 = vector.extract_strided_slice %23 {offsets = [0, 6], sizes = [64, 6], strides = [1, 1]} : vector<64x12xf32> to vector<64x6xf32>
    %cst_21 = arith.constant -2.000000e+01 : f32
    %cst_22 = arith.constant 2.000000e+00 : f32
    %27 = vector.broadcast %cst_21 : f32 to vector<64x6xf32>
    %28 = arith.maximumf %27, %26 : vector<64x6xf32>
    %29 = vector.broadcast %cst_22 : f32 to vector<64x6xf32>
    %30 = arith.minimumf %29, %28 : vector<64x6xf32>
    %31 = math.exp %30 : vector<64x6xf32>
    %c0_23 = arith.constant 0 : index
    %c0_24 = arith.constant 0 : index
    %32 = vector.load %arg10[%c0_23, %c0_24] : memref<64x6xf32, #tpu.memory_space<vmem>>, vector<64x6xf32>
    tpu.vector_store %arg10[%c0_23, %c0_24], %31 {strides = array<i32>} : memref<64x6xf32, #tpu.memory_space<vmem>>, vector<64x6xf32>,
    return
  }
  func.func @transform_0(%arg0: i32) -> (i32, i32) {
    %c0_i32 = arith.constant 0 : i32
    %c0_i32_0 = arith.constant 0 : i32
    return %arg0, %c0_i32 : i32, i32
  }
  func.func @transform_1(%arg0: i32) -> (i32, i32) {
    %c0_i32 = arith.constant 0 : i32
    %c0_i32_0 = arith.constant 0 : i32
    return %arg0, %c0_i32 : i32, i32
  }
  func.func @transform_2(%arg0: i32) -> (i32, i32) {
    %c0_i32 = arith.constant 0 : i32
    %c0_i32_0 = arith.constant 0 : i32
    %c0_i32_1 = arith.constant 0 : i32
    return %c0_i32, %c0_i32_0 : i32, i32
  }
  func.func @transform_3(%arg0: i32) -> (i32, i32) {
    %c0_i32 = arith.constant 0 : i32
    %c0_i32_0 = arith.constant 0 : i32
    %c0_i32_1 = arith.constant 0 : i32
    return %c0_i32, %c0_i32_0 : i32, i32
  }
  func.func @transform_4(%arg0: i32) -> (i32, i32) {
    %c0_i32 = arith.constant 0 : i32
    %c0_i32_0 = arith.constant 0 : i32
    %c0_i32_1 = arith.constant 0 : i32
    return %c0_i32, %c0_i32_0 : i32, i32
  }
  func.func @transform_5(%arg0: i32) -> (i32, i32) {
    %c0_i32 = arith.constant 0 : i32
    %c0_i32_0 = arith.constant 0 : i32
    %c0_i32_1 = arith.constant 0 : i32
    return %c0_i32, %c0_i32_0 : i32, i32
  }
  func.func @transform_6(%arg0: i32) -> (i32, i32) {
    %c0_i32 = arith.constant 0 : i32
    %c0_i32_0 = arith.constant 0 : i32
    %c0_i32_1 = arith.constant 0 : i32
    return %c0_i32, %c0_i32_0 : i32, i32
  }
  func.func @transform_7(%arg0: i32) -> (i32, i32) {
    %c0_i32 = arith.constant 0 : i32
    %c0_i32_0 = arith.constant 0 : i32
    %c0_i32_1 = arith.constant 0 : i32
    return %c0_i32, %c0_i32_0 : i32, i32
  }
  func.func @transform_8(%arg0: i32) -> (i32, i32) {
    %c0_i32 = arith.constant 0 : i32
    %c0_i32_0 = arith.constant 0 : i32
    return %arg0, %c0_i32 : i32, i32
  }
  func.func @transform_9(%arg0: i32) -> (i32, i32) {
    %c0_i32 = arith.constant 0 : i32
    %c0_i32_0 = arith.constant 0 : i32
    return %arg0, %c0_i32 : i32, i32
  }
}

</mosaic_0001>

<bundles_post_ra>
// kernel: mean_std_predictor.1
= control target key start
LH: loop header
LB: loop body
LE: loop exit
PB: predicated region body
PF: predicated region fallthrough
CT: control target
= control target key end

     0   :  { %s1149_s30 = smov 0   ;;  %s1242_s0 = inlined_call_operand.vmem [shape: bf16[128,6], index: 0, kind: input, shape index: {}]   ;;  %s1243_s1 = inlined_call_operand.vmem [shape: bf16[128,3], index: 1, kind: input, shape index: {}]   ;;  %s1244_s2 = inlined_call_operand.vmem [shape: bf16[9,32], index: 2, kind: input, shape index: {}]   ;;  %s1245_s3 = inlined_call_operand.vmem [shape: f32[1,32], index: 3, kind: input, shape index: {}]   ;;  %s1246_s4 = inlined_call_operand.vmem [shape: bf16[32,32], index: 4, kind: input, shape index: {}]   ;;  %s1247_s5 = inlined_call_operand.vmem [shape: f32[1,32], index: 5, kind: input, shape index: {}]   ;;  %s1248_s6 = inlined_call_operand.vmem [shape: bf16[32,12], index: 6, kind: input, shape index: {}]   ;;  %s1249_s7 = inlined_call_operand.vmem [shape: f32[1,12], index: 7, kind: input, shape index: {}]   ;;  %s1250_s8 = inlined_call_operand.vmem [shape: f32[128,6], index: 8, kind: output, shape index: {0}]   ;;  %s1251_s9 = inlined_call_operand.vmem [shape: f32[128,6], index: 9, kind: output, shape index: {1}]  }
   0x1 LB: > { %s952_s10 = sadd.s32 4294967295, %s1094_s30   ;;  %p956_p0 = scmp.ge.s32.totalorder %s1094_s30, 1  ;;  %s1094_s30 = sphi %s1149_s30, %s20_s30  }
   0x2   : > { %p302_p1 = scmp.lt.s32.totalorder %s1094_s30, 3 }
   0x4   : > { %p303_p2 = pnand %p956_p0, %p302_p1 }
   0x5   : > { %s957_s11 = sshll.u32 (!%p303_p2), %s952_s10, 3  ;;  %v1063_v0 = vld [vmem:[%s1244_s2] sm:$0x1f] (!%p303_p2)   ;;  %vm473_vm0 = vcmask (!%p303_p2), 1043456   ;;  %vm474_vm1 = vcmask (!%p303_p2), 1044480   ;;  %v1096_v1 = vmov (!%p303_p2), 65535  }
   0x6   : > { %306 = sbr.rel (%p303_p2) target bundleno = 943 (0x3af), region = 52  ;;  %p349_p3 = scmp.lt.s32.totalorder (!%p303_p2), %s957_s11, 15  ;;  %v475_v2 = vsel (!%p303_p2), %vm473_vm0, 4294967295, %v1096_v1  ;;  %vm437_vm2 = vcmask (!%p303_p2), 48128   ;;  %vm464_vm3 = vcmask (!%p303_p2), 72704   ;;  %v1068_v21 = vld [vmem:[%s1246_s4] sm:$0xff] (!%p303_p2)  }
   0x7   : > { %v476_v3 = vsel (!%p303_p2), %vm474_vm1, %v475_v2, 0  ;;  %s1097_s18 = smov (!%p303_p2), 6   ;;  %v1069_v22 = vld [vmem:[%s1246_s4 + $0x8] sm:$0xff] (!%p303_p2)   ;;  %v973_v23 = vld [vmem:[%s1245_s3] ss:$0 sm:$0xff] (!%p303_p2)  ;;  %vm580_vm4 = vcmask (!%p303_p2), 261120  }
   0x8   : > { %v478_v4 = vand.u32 (!%p303_p2), %v1063_v0, %v476_v3  ;;  %v1070_v52 = vld [vmem:[%s1248_s6] sm:$0xff] (!%p303_p2)   ;;  %v1071_v53 = vld [vmem:[%s1248_s6 + $0x8] sm:$0xff] (!%p303_p2)  }
   0x9   : > { %v979_v54 = vld [vmem:[%s1247_s5] ss:$0 sm:$0xff] (!%p303_p2) }
   0xa   : > { %1012 = vmatprep.subr.bf16.mxu0 (!%p303_p2), %v478_v4  ;;  %1046 = vmatprep.subr.bf16.mxu1 (!%p303_p2), %v478_v4 }
   0xb   : > { %1013 = vmatpush3.bf16.msra.mxu0 (!%p303_p2), %v478_v4  ;;  %1047 = vmatpush3.bf16.msra.mxu1 (!%p303_p2), %v478_v4 }
   0xc   : > { %1022 = vmatprep.subr.bf16.mxu1 (!%p303_p2), %v1068_v21  ;;  %1034 = vmatprep.subr.bf16.mxu0 (!%p303_p2), %v1070_v52 }
   0xd   : > { %s1253_s11 = smov (!%p349_p3, %s957_s11), 15 }
   0xe   : > { %s958_s14 = sshll.u32 %s1253_s11, 2  ;;  %s962_s15 = sshll.u32 %s1253_s11, 3 }
   0xf   : > { %s358_s17 = scalar_lea.vmem %s1243_s1, %s958_s14  ;;  %s352_s21 = scalar_lea.vmem %s1242_s0, %s958_s14 }
  0x10   : > { %v1059_v5 = vld [vmem:[%s358_s17] sm:$0xff]   ;;  %v1060_v6 = vld [vmem:[%s358_s17 + $0x8] sm:$0xff]   ;;  %v1061_v7 = vld [vmem:[%s358_s17 + $0x10] sm:$0xff]   ;;  %s1208_s20 = scalar_lea.vmem %s1250_s8, %s962_s15  ;;  %s370_s24 = scalar_lea.vmem %s1251_s9, %s962_s15 }
  0x11   : > { %429 = vrot.lane.b32.xlu0 %v1059_v5, %s1097_s18  ;;  %433 = vrot.lane.b32.xlu1 %v1061_v7, %s1097_s18  ;;  %v1062_v8 = vld [vmem:[%s358_s17 + $0x18] sm:$0xff]   ;;  %v1064_v9 = vld [vmem:[%s352_s21] sm:$0xff]  }
  0x12   : > { %v1067_v10 = vld [vmem:[%s352_s21 + $0x10] sm:$0xff]   ;;  %v1065_v13 = vld [vmem:[%s352_s21 + $0x8] sm:$0xff]   ;;  %v1066_v15 = vld [vmem:[%s352_s21 + $0x18] sm:$0xff]   ;;  %s1098_s21 = smov 122  }
  0x15   : > { %431 = vrot.lane.b32.xlu0 %v1060_v6, %s1097_s18  ;;  %435 = vrot.lane.b32.xlu1 %v1062_v8, %s1097_s18 }
  0x83   : > { %v430_v11 = vpop.permute.xlu0 %429  ;;  %v434_v14 = vpop.permute.xlu1 %433 }
  0x84   : > { %v440_v12 = vsel %vm437_vm2, %v1064_v9, %v430_v11  ;;  %v446_v16 = vsel %vm437_vm2, %v1067_v10, %v434_v14 }
  0x85   : > { %1014 = vmatprep.mubr.msk.bf16.mxu0 %vm464_vm3, %v440_v12  ;;  %1018 = vmatprep.mubr.msk.bf16.mxu1 %vm464_vm3, %v446_v16 }
  0x87   : > { %v432_v17 = vpop.permute.xlu0 %431  ;;  %v436_v19 = vpop.permute.xlu1 %435 }
  0x88   : > { %v443_v18 = vsel %vm437_vm2, %v1065_v13, %v432_v17  ;;  %v449_v20 = vsel %vm437_vm2, %v1066_v15, %v436_v19  ;;  %v986_v19 = vld [vmem:[%s1249_s7] ss:$0 sm:$0xff] }
  0x89   : > { %1015 = vmatmul.mubr.msk.bf16.vlgmr.msra.gmra.mrb[0].mxu0 %vm464_vm3, %v443_v18  ;;  %1019 = vmatmul.mubr.msk.bf16.vlgmr.msra.gmra.mrb[0].mxu1 %vm464_vm3, %v449_v20 }
  0x8a   : > { %1023 = vmatpush3.bf16.msra.mxu1 %v1068_v21  ;;  %1035 = vmatpush3.bf16.msra.mxu0 %v1070_v52 }
  0x8b   : > { %1024 = vmatprep.subr.bf16.mxu1 %v1069_v22  ;;  %1036 = vmatprep.subr.bf16.mxu0 %v1071_v53 }
  0x8e   : > { %1025 = vmatpush3.bf16.msra.mxu1 %v1069_v22  ;;  %1037 = vmatpush3.bf16.msra.mxu0 %v1071_v53 }
 0x15c   : > { %v1016_v24 = vpop.f32.mrb[0].mxu0  ;;  %v1020_v29 = vpop.f32.mrb[0].mxu1 }
 0x15d   : > { %v523_v25 = vadd.f32 %v1016_v24, %v973_v23  ;;  %v514_v26 = vpop.f32.mrb[1].mxu0  ;;  %v539_v32 = vadd.f32 %v1020_v29, %v973_v23  ;;  %v530_v33 = vpop.f32.mrb[1].mxu1 }
 0x15e   : > { %v515_v27 = vadd.f32 %v973_v23, %v514_v26  ;;  %v1017_v28 = vpop.f32.mrb[2].mxu0  ;;  %v531_v35 = vadd.f32 %v973_v23, %v530_v33  ;;  %v1021_v36 = vpop.f32.mrb[2].mxu1 }
 0x15f   : > { %v526_v30 = vadd.f32 %v1017_v28, %v973_v23  ;;  %v517_v31 = vpop.f32.mrb[3].mxu0  ;;  %v547_v37 = vmax.f32 %v523_v25, 0.0  ;;  %v551_v39 = vmax.f32 %v539_v32, 0.0  ;;  %v542_v40 = vadd.f32 %v1021_v36, %v973_v23  ;;  %v533_v41 = vpop.f32.mrb[3].mxu1 }
 0x160   : > { %v518_v34 = vadd.f32 %v973_v23, %v517_v31  ;;  %v545_v42 = vmax.f32 %v515_v27, 0.0  ;;  %v549_v44 = vmax.f32 %v531_v35, 0.0  ;;  %v534_v45 = vadd.f32 %v973_v23, %v533_v41 }
 0x161   : > { %v548_v38 = vmax.f32 %v526_v30, 0.0  ;;  %v552_v47 = vmax.f32 %v542_v40, 0.0 }
 0x162   : > { %v546_v43 = vmax.f32 %v518_v34, 0.0  ;;  %v550_v49 = vmax.f32 %v534_v45, 0.0 }
 0x163   : > { %v554_v46 = vpack.c.bf16 %v548_v38, %v547_v37  ;;  %v556_v50 = vpack.c.bf16 %v552_v47, %v551_v39 }
 0x164   : > { %v553_v48 = vpack.c.bf16 %v546_v43, %v545_v42  ;;  %v555_v51 = vpack.c.bf16 %v550_v49, %v549_v44 }
 0x166   : > { %1026 = vmatprep.mubr.msk.bf16.mxu1 %vm580_vm4, %v553_v48 }
 0x167   : > { %1027 = vmatmul.mubr.msk.bf16.vlgmr.msra.gmra.mrb[4].mxu1 %vm580_vm4, %v554_v46 }
 0x168   : > { %1030 = vmatprep.mubr.msk.bf16.mxu1 %vm580_vm4, %v555_v51 }
 0x16f   : > { %1031 = vmatmul.mubr.msk.bf16.gmra.mrb[8].mxu1 %vm580_vm4, %v556_v50 }
 0x23a   : > { %v1028_v55 = vpop.f32.mrb[4].mxu1 }
 0x23b   : > { %v636_v56 = vadd.f32 %v1028_v55, %v979_v54  ;;  %v627_v57 = vpop.f32.mrb[5].mxu1 }
 0x23c   : > { %v628_v58 = vadd.f32 %v979_v54, %v627_v57  ;;  %v1029_v59 = vpop.f32.mrb[6].mxu1 }
 0x23d   : > { %v639_v60 = vadd.f32 %v1029_v59, %v979_v54  ;;  %v630_v61 = vpop.f32.mrb[7].mxu1  ;;  %v660_v63 = vmax.f32 %v636_v56, 0.0 }
 0x23e   : > { %v631_v62 = vadd.f32 %v979_v54, %v630_v61  ;;  %v658_v1 = vmax.f32 %v628_v58, 0.0 }
 0x23f   : > { %v661_v0 = vmax.f32 %v639_v60, 0.0 }
 0x240   : > { %v659_v2 = vmax.f32 %v631_v62, 0.0 }
 0x241   : > { %v667_v3 = vpack.c.bf16 %v661_v0, %v660_v63 }
 0x242   : > { %v666_v4 = vpack.c.bf16 %v659_v2, %v658_v1  ;;  %v1032_v5 = vpop.f32.mrb[8].mxu1 }
 0x243   : > { %v652_v6 = vadd.f32 %v1032_v5, %v979_v54  ;;  %v643_v7 = vpop.f32.mrb[9].mxu1 }
 0x244   : > { %v644_v8 = vadd.f32 %v979_v54, %v643_v7  ;;  %v1033_v9 = vpop.f32.mrb[10].mxu1  ;;  %1038 = vmatprep.mubr.msk.bf16.mxu0 %vm580_vm4, %v666_v4 }
 0x245   : > { %v655_v10 = vadd.f32 %v1033_v9, %v979_v54  ;;  %v646_v11 = vpop.f32.mrb[11].mxu1  ;;  %1039 = vmatmul.mubr.msk.bf16.vlgmr.msra.gmra.mrb[4].mxu0 %vm580_vm4, %v667_v3  ;;  %v664_v13 = vmax.f32 %v652_v6, 0.0 }
 0x246   : > { %v647_v12 = vadd.f32 %v979_v54, %v646_v11  ;;  %v662_v15 = vmax.f32 %v644_v8, 0.0 }
 0x247   : > { %v665_v14 = vmax.f32 %v655_v10, 0.0 }
 0x248   : > { %v663_v16 = vmax.f32 %v647_v12, 0.0 }
 0x249   : > { %v669_v17 = vpack.c.bf16 %v665_v14, %v664_v13 }
 0x24a   : > { %v668_v18 = vpack.c.bf16 %v663_v16, %v662_v15 }
 0x24c   : > { %1042 = vmatprep.mubr.msk.bf16.mxu0 %vm580_vm4, %v668_v18 }
 0x24d   : > { %1043 = vmatmul.mubr.msk.bf16.gmra.mrb[8].mxu0 %vm580_vm4, %v669_v17 }
 0x318   : > { %v1040_v20 = vpop.f32.mrb[4].mxu0 }
 0x319   : > { %v748_v21 = vadd.f32 %v1040_v20, %v986_v19  ;;  %v739_v22 = vpop.f32.mrb[5].mxu0 }
 0x31a   : > { %v740_v23 = vadd.f32 %v986_v19, %v739_v22  ;;  %v1041_v24 = vpop.f32.mrb[6].mxu0 }
 0x31b   : > { %772 = vst.msk [vmem:[%s1208_s20 + $0x10] sm:$0xff] %vm437_vm2, %v748_v21  ;;  %v780_v25 = vmax.f32 %v748_v21, -20.0  ;;  %v751_v26 = vadd.f32 %v1041_v24, %v986_v19  ;;  %v742_v27 = vpop.f32.mrb[7].mxu0 }
 0x31c   : > { %770 = vst.msk [vmem:[%s1208_s20] sm:$0xff] %vm437_vm2, %v740_v23  ;;  %v778_v28 = vmax.f32 %v740_v23, -20.0  ;;  %v743_v29 = vadd.f32 %v986_v19, %v742_v27 }
 0x31d   : > { %v788_v30 = vmin.f32 %v780_v25, 2.0  ;;  %773 = vst.msk [vmem:[%s1208_s20 + $0x18] sm:$0xff] %vm437_vm2, %v751_v26  ;;  %v781_v31 = vmax.f32 %v751_v26, -20.0 }
 0x31e   : > { %v786_v32 = vmin.f32 %v778_v28, 2.0  ;;  %771 = vst.msk [vmem:[%s1208_s20 + $0x8] sm:$0xff] %vm437_vm2, %v743_v29  ;;  %v779_v33 = vmax.f32 %v743_v29, -20.0 }
 0x31f   : > { %v798_v34 = vmul.f32 1.442695, %v788_v30  ;;  %v789_v35 = vmin.f32 %v781_v31, 2.0 }
 0x320   : > { %v787_v36 = vmin.f32 %v779_v33, 2.0  ;;  %v1044_v37 = vpop.f32.mrb[8].mxu0  ;;  %v794_v38 = vmul.f32 1.442695, %v786_v32 }
 0x321   : > { %1072 = vpow2.f32 %v798_v34  ;;  %v800_v39 = vmul.f32 1.442695, %v789_v35  ;;  %v764_v40 = vadd.f32 %v1044_v37, %v986_v19  ;;  %v755_v41 = vpop.f32.mrb[9].mxu0 }
 0x322   : > { %v756_v42 = vadd.f32 %v986_v19, %v755_v41  ;;  %v1045_v43 = vpop.f32.mrb[10].mxu0  ;;  %v796_v44 = vmul.f32 1.442695, %v787_v36 }
 0x323   : > { %1074 = vpow2.f32 %v800_v39  ;;  %776 = vst.msk [vmem:[%s1208_s20 + $0x30] sm:$0xff] %vm437_vm2, %v764_v40  ;;  %v784_v45 = vmax.f32 %v764_v40, -20.0  ;;  %v767_v46 = vadd.f32 %v1045_v43, %v986_v19  ;;  %v758_v47 = vpop.f32.mrb[11].mxu0 }
 0x324   : > { %774 = vst.msk [vmem:[%s1208_s20 + $0x20] sm:$0xff] %vm437_vm2, %v756_v42  ;;  %v782_v48 = vmax.f32 %v756_v42, -20.0  ;;  %v759_v49 = vadd.f32 %v986_v19, %v758_v47  ;;  %1076 = vpow2.f32 %v794_v38 }
 0x325   : > { %777 = vst.msk [vmem:[%s1208_s20 + $0x38] sm:$0xff] %vm437_vm2, %v767_v46  ;;  %v785_v50 = vmax.f32 %v767_v46, -20.0  ;;  %v792_v51 = vmin.f32 %v784_v45, 2.0  ;;  %1078 = vpow2.f32 %v796_v44 }
 0x326   : > { %v790_v52 = vmin.f32 %v782_v48, 2.0  ;;  %775 = vst.msk [vmem:[%s1208_s20 + $0x28] sm:$0xff] %vm437_vm2, %v759_v49  ;;  %v783_v53 = vmax.f32 %v759_v49, -20.0 }
 0x327   : > { %v793_v55 = vmin.f32 %v785_v50, 2.0  ;;  %v806_v57 = vmul.f32 1.442695, %v792_v51 }
 0x328   : > { %v802_v54 = vmul.f32 1.442695, %v790_v52  ;;  %v791_v56 = vmin.f32 %v783_v53, 2.0 }
 0x329   : > { %v808_v60 = vmul.f32 1.442695, %v793_v55 }
 0x32a   : > { %1080 = vpow2.f32 %v802_v54  ;;  %v804_v58 = vmul.f32 1.442695, %v791_v56 }
 0x32b   : > { %v1073_v59 = vpop.eup %1072 }
 0x32c   : > { %1082 = vpow2.f32 %v804_v58  ;;  %822 = vrot.lane.b32.xlu0 %v1073_v59, %s1098_s21 }
 0x32d   : > { %v1075_v61 = vpop.eup %1074  ;;  %1084 = vpow2.f32 %v806_v57 }
 0x32e   : > { %824 = vrot.lane.b32.xlu1 %v1075_v61, %s1098_s21  ;;  %v1077_v62 = vpop.eup %1076  ;;  %1086 = vpow2.f32 %v808_v60 }
 0x32f   : > { %v1079_v63 = vpop.eup %1078 }
 0x330   : > { %818 = vrot.lane.b32.xlu0 %v1077_v62, %s1098_s21 }
 0x332   : > { %820 = vrot.lane.b32.xlu1 %v1079_v63, %s1098_s21 }
 0x334   : > { %v1081_v0 = vpop.eup %1080 }
 0x335   : > { %826 = vrot.lane.b32.xlu0 %v1081_v0, %s1098_s21 }
 0x336   : > { %v1083_v1 = vpop.eup %1082 }
 0x337   : > { %828 = vrot.lane.b32.xlu1 %v1083_v1, %s1098_s21  ;;  %v1085_v2 = vpop.eup %1084 }
 0x338   : > { %v1087_v3 = vpop.eup %1086 }
 0x339   : > { %830 = vrot.lane.b32.xlu0 %v1085_v2, %s1098_s21 }
 0x33b   : > { %832 = vrot.lane.b32.xlu1 %v1087_v3, %s1098_s21 }
 0x39e   : > { %v823_v4 = vpop.permute.xlu0 %822 }
 0x39f   : > { %844 = vst.msk [vmem:[%s370_s24 + $0x10] sm:$0xff] %vm437_vm2, %v823_v4 }
 0x3a0   : > { %v825_v5 = vpop.permute.xlu1 %824 }
 0x3a1   : > { %845 = vst.msk [vmem:[%s370_s24 + $0x18] sm:$0xff] %vm437_vm2, %v825_v5 }
 0x3a2   : > { %v819_v6 = vpop.permute.xlu0 %818 }
 0x3a3   : > { %842 = vst.msk [vmem:[%s370_s24] sm:$0xff] %vm437_vm2, %v819_v6 }
 0x3a4   : > { %v821_v7 = vpop.permute.xlu1 %820 }
 0x3a5   : > { %843 = vst.msk [vmem:[%s370_s24 + $0x8] sm:$0xff] %vm437_vm2, %v821_v7 }
 0x3a7   : > { %v827_v8 = vpop.permute.xlu0 %826 }
 0x3a8   : > { %846 = vst.msk [vmem:[%s370_s24 + $0x20] sm:$0xff] %vm437_vm2, %v827_v8 }
 0x3a9   : > { %v829_v9 = vpop.permute.xlu1 %828 }
 0x3aa   : > { %847 = vst.msk [vmem:[%s370_s24 + $0x28] sm:$0xff] %vm437_vm2, %v829_v9 }
 0x3ab   : > { %v831_v10 = vpop.permute.xlu0 %830 }
 0x3ac   : > { %848 = vst.msk [vmem:[%s370_s24 + $0x30] sm:$0xff] %vm437_vm2, %v831_v10 }
 0x3ad   : > { %v833_v11 = vpop.permute.xlu1 %832 }
 0x3ae   : > { %849 = vst.msk [vmem:[%s370_s24 + $0x38] sm:$0xff] %vm437_vm2, %v833_v11 }
 0x3af PF: > { %s20_s30 = sadd.s32 1, %s1094_s30  }
 0x3b0   : > { %p17_p4 = scmp.ge.s32.totalorder %s20_s30, 4  }
 0x3b2   :  { %19 = sbr.rel (!%p17_p4) target bundleno = 1 (0x1), region = 97 }

</bundles_post_ra>
